<compile_context>
chip_gen: v5e
topology: v5e:2x2
jax: 0.10.0
libtpu: 0.0.40
codegen_flags: <defaults>
</compile_context>

<pallas_src>
import functools

import jax
import jax.numpy as jnp
from jax.experimental import pallas as pl
from jax.experimental.pallas import tpu as pltpu

EPS = 1e-6


def _sublayer_connection_kernel(x_ref, w_ref, b_ref, o_ref):
    """One (TM, H) row tile: out = x + (centered(x) * inv_std) @ w' + b'."""
    x = x_ref[...].astype(jnp.float32)                         # (TM, H)
    n = x.shape[-1]
    inv_nm1 = jnp.float32(1.0 / (n - 1))                       # Bessel factor

    # --- LayerNorm stats (torch-style: unbiased std, eps added to std) ---
    mean = jnp.mean(x, axis=-1, keepdims=True)                 # (TM, 1)
    centered = x - mean
    var_unbiased = jnp.sum(centered * centered, axis=-1, keepdims=True) * inv_nm1
    std = jnp.sqrt(var_unbiased)
    inv_std = pl.reciprocal(std + EPS, approx=True)            # (TM, 1), EUP slot
    normed = centered * inv_std                                # a2/b2 folded into w'/b'

    # --- sublayer Linear on the MXU (bf16 operands, f32 accumulate) ---
    y = jnp.dot(normed.astype(jnp.bfloat16), w_ref[...],
                preferred_element_type=jnp.float32)
    y = y + b_ref[...]                                         # fused bias (1, H)

    # --- dropout (eval mode => identity) + residual ---
    # TODO(synk): training-mode dropout would use pltpu.prng_seed /
    # pltpu.prng_random_bits seeded per pl.program_id(0) tile.
    o_ref[...] = (x + y).astype(o_ref.dtype)


def sublayer_connection(x, a2, b2, w, b_sub, *, tm=512):
    """x: (B, S, H) float32. Returns x + Linear(LayerNorm(x)) (dropout=eval)."""
    B, S, H = x.shape
    rows = B * S

    # Fold the LayerNorm affine into the Linear once (O(H^2), outside hot loop,
    # fused by XLA since the wrapper is jitted).
    w_folded = (a2[:, None] * w).astype(jnp.bfloat16)          # (H, H) bf16 resident
    b_folded = (b2 @ w + b_sub).astype(jnp.float32).reshape(1, H)

    # Row-tile size: multiple of 8 sublanes, no larger than the (padded) rows.
    tm = min(tm, pl.cdiv(rows, 8) * 8)
    rows_p = pl.cdiv(rows, tm) * tm
    x2d = x.reshape(rows, H)
    if rows_p != rows:
        x2d = jnp.pad(x2d, ((0, rows_p - rows), (0, 0)))       # zero rows are benign

    grid = (rows_p // tm,)

    # VMEM budget: resident weight/bias + double-buffered in/out tiles + headroom.
    needed = (w_folded.size * 2 + H * 4
              + 2 * 2 * tm * H * 4
              + (4 << 20))
    vmem_limit = min(max(needed, 16 << 20), 64 << 20)

    cost = pl.CostEstimate(
        flops=2 * rows_p * H * H,
        transcendentals=2 * rows_p,                            # sqrt + reciprocal / row
        bytes_accessed=2 * rows_p * H * 4 + H * H * 2 + H * 4,
    )

    out2d = pl.pallas_call(
        _sublayer_connection_kernel,
        out_shape=jax.ShapeDtypeStruct((rows_p, H), x.dtype),
        grid_spec=pltpu.PrefetchScalarGridSpec(
            num_scalar_prefetch=0,
            grid=grid,
            in_specs=[
                pl.BlockSpec((tm, H), lambda i: (i, 0)),       # x tile (pipelined)
                pl.BlockSpec((H, H), lambda i: (0, 0)),        # bf16 weight, resident
                pl.BlockSpec((1, H), lambda i: (0, 0)),        # fused bias, resident
            ],
            out_specs=pl.BlockSpec((tm, H), lambda i: (i, 0)),
        ),
        compiler_params=pltpu.CompilerParams(
            dimension_semantics=("parallel",),
            vmem_limit_bytes=int(vmem_limit),
        ),
        cost_estimate=cost,
    )(x2d, w_folded, b_folded)

    return out2d[:rows].reshape(B, S, H)


def _reference(x, a2, b2, w, b_sub):
    # Pure-JAX (f32) reference mirroring the PyTorch forward.
    mean = jnp.mean(x, axis=-1, keepdims=True)
    std = jnp.std(x, axis=-1, keepdims=True, ddof=1)  # unbiased, like torch .std()
    normed = a2 * (x - mean) / (std + EPS) + b2
    y = normed @ w + b_sub
    return x + y


if __name__ == "__main__":
    # Small but lane-dense demo shape (H = 128 keeps the output lane-dense).
    B, S, H = 2, 8, 128
    key = jax.random.PRNGKey(0)
    kx, kw, kb = jax.random.split(key, 3)

    x = jax.random.normal(kx, (B, S, H), dtype=jnp.float32)

    # LayerNorm params: exactly as in __init__ (ones / zeros).
    a2 = jnp.ones((H,), dtype=jnp.float32)
    b2 = jnp.zeros((H,), dtype=jnp.float32)

    # Deterministic sublayer Linear(H, H) params.
    w = jax.random.normal(kw, (H, H), dtype=jnp.float32) * (1.0 / jnp.sqrt(H))
    b_sub = jax.random.normal(kb, (H,), dtype=jnp.float32) * 0.01

    run = jax.jit(functools.partial(sublayer_connection, tm=512))
    out = run(x, a2, b2, w, b_sub)
    out = jax.block_until_ready(out)

    ref = _reference(x, a2, b2, w, b_sub)
    assert out.shape == (B, S, H)
    # Tolerance loosened: matmul runs with bf16 operands (f32 accumulate) and
    # 1/(std+eps) uses the approximate EUP reciprocal.
    assert jnp.allclose(out, ref, atol=5e-2, rtol=5e-2), "mismatch vs reference"

    print("KERNEL_OK")
</pallas_src>

<mosaic_0001>
module attributes {stable_mosaic.version = 11 : i64} {
  func.func @_sublayer_connection_kernel(%arg0: i32, %arg1: memref<16x128xf32, #tpu.memory_space<vmem>>, %arg2: memref<128x128xbf16, #tpu.memory_space<vmem>>, %arg3: memref<1x128xf32, #tpu.memory_space<vmem>>, %arg4: memref<16x128xf32, #tpu.memory_space<vmem>>) attributes {dimension_semantics = [#tpu.dimension_semantics<parallel>], iteration_bounds = array<i64: 1>, scalar_prefetch = 0 : i64, scratch_operands = 0 : i64, tpu.core_type = #tpu.core_type<tc>, window_params = [{transform_indices = @transform_0, window_bounds = array<i64: 16, 128>}, {pipeline_mode = #tpu.pipeline_mode<synchronous>, transform_indices = @transform_1, window_bounds = array<i64: 128, 128>}, {pipeline_mode = #tpu.pipeline_mode<synchronous>, transform_indices = @transform_2, window_bounds = array<i64: 1, 128>}, {transform_indices = @transform_3, window_bounds = array<i64: 16, 128>}]} {
    %c0 = arith.constant 0 : index
    %c0_0 = arith.constant 0 : index
    %0 = vector.load %arg1[%c0, %c0_0] : memref<16x128xf32, #tpu.memory_space<vmem>>, vector<16x128xf32>
    %cst = arith.constant dense<0.000000e+00> : vector<16xf32>
    %1 = vector.multi_reduction <add>, %0, %cst [1] : vector<16x128xf32> to vector<16xf32>
    %2 = vector.shape_cast %1 : vector<16xf32> to vector<16x1xf32>
    %cst_1 = arith.constant 1.280000e+02 : f32
    %3 = vector.broadcast %cst_1 : f32 to vector<16x1xf32>
    %4 = arith.divf %2, %3 : vector<16x1xf32>
    %5 = vector.broadcast %4 : vector<16x1xf32> to vector<16x128xf32>
    %6 = arith.subf %0, %5 : vector<16x128xf32>
    %7 = arith.mulf %6, %6 : vector<16x128xf32>
    %cst_2 = arith.constant dense<0.000000e+00> : vector<16xf32>
    %8 = vector.multi_reduction <add>, %7, %cst_2 [1] : vector<16x128xf32> to vector<16xf32>
    %9 = vector.shape_cast %8 : vector<16xf32> to vector<16x1xf32>
    %cst_3 = arith.constant 0.00787401571 : f32
    %10 = vector.broadcast %cst_3 : f32 to vector<16x1xf32>
    %11 = arith.mulf %9, %10 : vector<16x1xf32>
    %12 = math.sqrt %11 : vector<16x1xf32>
    %cst_4 = arith.constant 9.99999997E-7 : f32
    %13 = vector.broadcast %cst_4 : f32 to vector<16x1xf32>
    %14 = arith.addf %12, %13 : vector<16x1xf32>
    %15 = tpu.reciprocal %14 {approx = true} : vector<16x1xf32> -> vector<16x1xf32>
    %16 = vector.broadcast %15 : vector<16x1xf32> to vector<16x128xf32>
    %17 = arith.mulf %6, %16 : vector<16x128xf32>
    %18 = arith.truncf %17 : vector<16x128xf32> to vector<16x128xbf16>
    %c0_5 = arith.constant 0 : index
    %c0_6 = arith.constant 0 : index
    %19 = vector.load %arg2[%c0_5, %c0_6] : memref<128x128xbf16, #tpu.memory_space<vmem>>, vector<128x128xbf16>
    %cst_7 = arith.constant dense<0.000000e+00> : vector<16x128xf32>
    %20 = tpu.matmul %18, %19, %cst_7 {dimension_numbers = #tpu.dot_dimension_numbers<[1], [0], [0], [1], [0, 0, 1, 1], [], []>} : vector<16x128xbf16>, vector<128x128xbf16>, vector<16x128xf32> -> vector<16x128xf32>
    %c0_8 = arith.constant 0 : index
    %c0_9 = arith.constant 0 : index
    %21 = vector.load %arg3[%c0_8, %c0_9] : memref<1x128xf32, #tpu.memory_space<vmem>>, vector<1x128xf32>
    %22 = vector.broadcast %21 : vector<1x128xf32> to vector<16x128xf32>
    %23 = arith.addf %20, %22 : vector<16x128xf32>
    %24 = arith.addf %0, %23 : vector<16x128xf32>
    %c0_10 = arith.constant 0 : index
    %c0_11 = arith.constant 0 : index
    %25 = vector.load %arg4[%c0_10, %c0_11] : memref<16x128xf32, #tpu.memory_space<vmem>>, vector<16x128xf32>
    tpu.vector_store %arg4[%c0_10, %c0_11], %24 {strides = array<i32>} : memref<16x128xf32, #tpu.memory_space<vmem>>, vector<16x128xf32>,
    return
  }
  func.func @transform_0(%arg0: i32) -> (i32, i32) {
    %c0_i32 = arith.constant 0 : i32
    %c0_i32_0 = arith.constant 0 : i32
    return %arg0, %c0_i32 : i32, i32
  }
  func.func @transform_1(%arg0: i32) -> (i32, i32) {
    %c0_i32 = arith.constant 0 : i32
    %c0_i32_0 = arith.constant 0 : i32
    %c0_i32_1 = arith.constant 0 : i32
    return %c0_i32, %c0_i32_0 : i32, i32
  }
  func.func @transform_2(%arg0: i32) -> (i32, i32) {
    %c0_i32 = arith.constant 0 : i32
    %c0_i32_0 = arith.constant 0 : i32
    %c0_i32_1 = arith.constant 0 : i32
    return %c0_i32, %c0_i32_0 : i32, i32
  }
  func.func @transform_3(%arg0: i32) -> (i32, i32) {
    %c0_i32 = arith.constant 0 : i32
    %c0_i32_0 = arith.constant 0 : i32
    return %arg0, %c0_i32 : i32, i32
  }
}

</mosaic_0001>

<bundles_post_ra>
// kernel: sublayer_connection.1
= control target key start
LH: loop header
LB: loop body
LE: loop exit
PB: predicated region body
PF: predicated region fallthrough
CT: control target
= control target key end

     0   :  { %s326_s0 = inlined_call_operand.vmem [shape: f32[16,128], index: 0, kind: input, shape index: {}]   ;;  %s327_s1 = inlined_call_operand.vmem [shape: bf16[128,128], index: 1, kind: input, shape index: {}]   ;;  %s328_s2 = inlined_call_operand.vmem [shape: f32[1,128], index: 2, kind: input, shape index: {}]   ;;  %s329_s3 = inlined_call_operand.hbm [shape: f32[16,128], index: 3, kind: output, shape index: {}]  }
   0x1   :  { %v283_v0 = vld [vmem:[%s326_s0] sm:$0xff] }
   0x2   :  { %17 = vadd.xlane.f32.xlu0 %v283_v0 }
   0x3   :  { %8 = vsyncpa [#allocation3], 0  ;;  %v289_v1 = vld [vmem:[%s326_s0 + $0x8] sm:$0xff]  ;;  %v256_v2 = vmov 128.0   ;;  %v214_v17 = vld [vmem:[%s327_s1 + $0x38] sm:$0xff]  ;;  %s257_s5 = smov [#allocation2]  }
   0x4   :  { %220 = vrcp.f32 %v256_v2  ;;  %139 = vmatpush.bf16.msra.mxu0 %v214_v17  ;;  %v213_v18 = vld [vmem:[%s327_s1 + $0x30] sm:$0xff]  ;;  %v212_v19 = vld [vmem:[%s327_s1 + $0x28] sm:$0xff]  ;;  %v211_v20 = vld [vmem:[%s327_s1 + $0x20] sm:$0xff]  ;;  %s161_s6 = sshll.u32 %s257_s5, 4  ;;  %s163_s9 = sshll.u32 %s329_s3, 4  ;;  %s162_s6 = int_to_ptr.vmem [resolvable:$true] %s161_s6  ;;  %s164_s9 = int_to_ptr.hbm [resolvable:$true] %s163_s9 }
   0x5   :  { %v210_v21 = vld [vmem:[%s327_s1 + $0x18] sm:$0xff]  ;;  %v209_v22 = vld [vmem:[%s327_s1 + $0x10] sm:$0xff]  ;;  %v208_v25 = vld [vmem:[%s327_s1 + $0x8] sm:$0xff]  ;;  %s258_s10 = smov 128  }
   0x6   :  { %v207_v26 = vld [vmem:[%s327_s1] sm:$0xff] }
   0x7   :  { %v219_v56 = vld [vmem:[%s328_s2] ss:$0 sm:$0xff]  ;;  %s259_s2 = smov 8  }
   0x8   :  { %140 = vmatpush.bf16.msra.mxu0 %v213_v18 }
   0xa   :  { %19 = vadd.xlane.f32.xlu0 %v289_v1  ;;  %v221_v3 = vpop.eup %220 }
   0xb   :  { %v22_v4 = vmul.f32 128.0, %v221_v3  ;;  %vm26_vm0 = vweird.f32 %v221_v3 }
   0xc   :  { %141 = vmatpush.bf16.msra.mxu0 %v212_v19 }
   0xd   :  { %v23_v5 = vsub.f32 1.0, %v22_v4 }
   0xf   :  { %v24_v6 = vmul.f32 %v221_v3, %v23_v5 }
  0x10   :  { %142 = vmatpush.bf16.msra.mxu0 %v211_v20 }
  0x11   :  { %v25_v7 = vadd.f32 %v221_v3, %v24_v6 }
  0x13   :  { %v27_v8 = vsel %vm26_vm0, %v221_v3, %v25_v7 }
  0x14   :  { %143 = vmatpush.bf16.msra.mxu0 %v210_v21 }
  0x18   :  { %144 = vmatpush.bf16.msra.mxu0 %v209_v22 }
  0x1c   :  { %145 = vmatpush.bf16.msra.mxu0 %v208_v25 }
  0x20   :  { %146 = vmatpush.bf16.msra.mxu0 %v207_v26 }
  0x75   :  { %v18_v9 = vpop.xlane.xlu0 %17 }
  0x76   :  { %v28_v10 = vmul.f32 %v27_v8, %v18_v9 }
  0x78   :  { %v30_v11 = vsub.f32 %v283_v0, %v28_v10 }
  0x7a   :  { %v32_v12 = vmul.f32 %v30_v11, %v30_v11 }
  0x7c   :  { %34 = vadd.xlane.f32.xlu1 %v32_v12 }
  0x7d   :  { %v20_v13 = vpop.xlane.xlu0 %19 }
  0x7e   :  { %v29_v14 = vmul.f32 %v27_v8, %v20_v13 }
  0x80   :  { %v31_v15 = vsub.f32 %v289_v1, %v29_v14 }
  0x82   :  { %v33_v16 = vmul.f32 %v31_v15, %v31_v15 }
  0x84   :  { %36 = vadd.xlane.f32.xlu1 %v33_v16 }
  0xef   :  { %v35_v23 = vpop.xlane.xlu1 %34 }
  0xf0   :  { %v38_v24 = vmul.f32 0.007874016, %v35_v23 }
  0xf2   :  { %222 = vrsqrt.f32 %v38_v24  ;;  %vm47_vm1 = vcmp.eq.f32.partialorder %v38_v24, inf  ;;  %v50_v41 = vand.u32 2147483648, %v38_v24  ;;  %vm49_vm2 = vcmp.eq.f32.partialorder %v38_v24, 0.0 }
  0xf7   :  { %v37_v27 = vpop.xlane.xlu1 %36 }
  0xf8   :  { %v223_v28 = vpop.eup %222  ;;  %v39_v29 = vmul.f32 0.007874016, %v37_v27 }
  0xf9   :  { %v41_v30 = vmul.f32 %v223_v28, %v38_v24 }
  0xfa   :  { %224 = vrsqrt.f32 %v39_v29  ;;  %vm59_vm3 = vcmp.eq.f32.partialorder %v39_v29, inf  ;;  %v62_v47 = vand.u32 2147483648, %v39_v29  ;;  %vm61_vm4 = vcmp.eq.f32.partialorder %v39_v29, 0.0 }
  0xfb   :  { %v42_v31 = vmul.f32 %v223_v28, %v41_v30 }
  0xfd   :  { %v43_v32 = vmul.f32 0.5, %v42_v31 }
  0xff   :  { %v44_v33 = vsub.f32 1.5, %v43_v32 }
 0x100   :  { %v225_v34 = vpop.eup %224 }
 0x101   :  { %v53_v35 = vmul.f32 %v225_v34, %v39_v29  ;;  %v45_v36 = vmul.f32 %v223_v28, %v44_v33 }
 0x103   :  { %v46_v37 = vmul.f32 %v45_v36, %v38_v24  ;;  %v54_v38 = vmul.f32 %v225_v34, %v53_v35 }
 0x105   :  { %v48_v39 = vsel %vm47_vm1, %v38_v24, %v46_v37  ;;  %v55_v40 = vmul.f32 0.5, %v54_v38 }
 0x106   :  { %v51_v43 = vsel %vm49_vm2, %v50_v41, %v48_v39 }
 0x107   :  { %v56_v42 = vsub.f32 1.5, %v55_v40  ;;  %v64_v46 = vadd.f32 1e-06, %v51_v43 }
 0x109   :  { %v57_v44 = vmul.f32 %v225_v34, %v56_v42  ;;  %226 = vrcp.f32 %v64_v46 }
 0x10b   :  { %v58_v45 = vmul.f32 %v57_v44, %v39_v29 }
 0x10d   :  { %v60_v48 = vsel %vm59_vm3, %v39_v29, %v58_v45 }
 0x10e   :  { %v63_v49 = vsel %vm61_vm4, %v62_v47, %v60_v48 }
 0x10f   :  { %v65_v50 = vadd.f32 1e-06, %v63_v49  ;;  %v227_v51 = vpop.eup %226 }
 0x110   :  { %v68_v53 = vmul.f32 %v227_v51, %v30_v11 }
 0x111   :  { %228 = vrcp.f32 %v65_v50 }
 0x117   :  { %v229_v52 = vpop.eup %228 }
 0x118   :  { %v69_v54 = vmul.f32 %v229_v52, %v31_v15 }
 0x11a   :  { %v70_v55 = vpack.c.bf16 %v69_v54, %v68_v53 }
 0x11c   :  { %147 = vmatmul.bf16.vlgmr.msra.gmra.mxu0 %v70_v55 }
 0x199   :  { %v148_v57 = vpop.f32.mrf.mxu0 }
 0x19a   :  { %v149_v58 = vadd.f32 %v219_v56, %v148_v57 }
 0x19c   :  { %v153_v59 = vadd.f32 %v149_v58, %v283_v0 }
 0x19e   :  { %155 = vst [vmem:[#allocation2] sm:$0xff] %v153_v59 }
 0x1a1   :  { %v150_v60 = vpop.f32.mrf.mxu0 }
 0x1a2   :  { %v151_v61 = vadd.f32 %v219_v56, %v150_v60 }
 0x1a4   :  { %v154_v62 = vadd.f32 %v151_v61, %v289_v1 }
 0x1a6   :  { %156 = vst [vmem:[#allocation2 + $0x8] sm:$0xff] %v154_v62 }
 0x1a7   :  { %169 = dma.vmem_to_hbm [thread:$0]  %s162_s6, 256, %s164_s9, [#allocation3], %s258_s10, %s258_s10, %s259_s2  }
 0x1a8   :  { %254 = dma.done.wait [#allocation3], 256  }
 0x1a9   :  { %255 = vsyncadd [#allocation3], 4294967040 }
 0x1aa   :  { %174 = vsyncpa [#allocation3], 1 }

</bundles_post_ra>
